<compile_context>
chip_gen: v7x
topology: tpu7x:2x2x1
jax: 0.10.0
libtpu: 0.0.40
codegen_flags: <defaults>
</compile_context>

<pallas_src>
import functools

import jax
import jax.numpy as jnp
from jax.experimental import pallas as pl
from jax.experimental.pallas import tpu as pltpu


_VMEM_BUDGET = 24 * 1024 * 1024        # conservative slab budget (v7x: 64 MiB phys)
_TARGET_STEP_BYTES = 2 * 1024 * 1024   # aim for >= ~2 MiB of activation per step


def _pad_up(n, m):
    return -(-n // m) * m


def _sublane_tile(itemsize):
    # Native VMEM tiles: (8,128) f32, (16,128) bf16, (32,128) 8-bit.
    return 8 * (4 // itemsize)


def _block_bytes(bb, sub, lane, itemsize):
    """(native-dtype bytes, f32 bytes) of one (bb, sub, lane) block incl. padding."""
    sub_p = _pad_up(sub, _sublane_tile(itemsize))
    lane_p = _pad_up(lane, 128)
    return bb * sub_p * lane_p * itemsize, bb * _pad_up(sub, 8) * lane_p * 4


def _pick_block_batch(b, sub, lane, itemsize, weight_bytes):
    """Choose batches-per-grid-step `bb` from an explicit VMEM budget."""
    nat1, f321 = _block_bytes(1, sub, lane, itemsize)
    # 2x double-buffered input + 2x double-buffered output + up to two f32
    # temps (worst case if Mosaic materialises the upcast) + resident weights.
    per_bb = 4 * nat1 + 2 * f321
    if per_bb + weight_bytes > _VMEM_BUDGET:
        # TODO(synk): fall back to a two-phase pool-then-scale kernel here.
        raise ValueError(
            "single-batch SE slab exceeds the VMEM budget "
            f"({per_bb + weight_bytes} B > {_VMEM_BUDGET} B)")

    bb_vmem = max(1, (_VMEM_BUDGET - weight_bytes) // per_bb)
    bb_target = max(1, -(-_TARGET_STEP_BYTES // nat1))   # amortize per-step overhead
    bb_cap = min(bb_target, bb_vmem, b)
    if b >= 2:
        bb_cap = min(bb_cap, b // 2)    # keep grid >= 2 so v7x megacore can shard it
    bb_cap = max(bb_cap, 1)

    # Pick a divisor of b (no ragged last block); prefer an even grid length.
    divisors = [d for d in range(1, b + 1) if b % d == 0 and d <= bb_cap]
    even = [d for d in divisors if (b // d) % 2 == 0]
    bb = max(even) if (b >= 2 and even) else max(divisors)
    return bb, bb * per_bb + weight_bytes


def _se_kernel(x_ref, w1_ref, b1_ref, w2_ref, b2_ref, o_ref, *, inv_hw,
               channels_last):
    """One grid step over a (bb, HW, C) (channels_last) or (bb, C, HW) block.

    Squeeze (mean over spatial) -> Linear -> SiLU -> Linear -> sigmoid -> scale.
    The activation block stays in its I/O dtype; all internal math is f32.
    """
    x = x_ref[...]                                         # (bb, S, L), native dtype

    # Squeeze: f32-accumulating reduce straight off the loaded block (no full
    # f32 copy of the slab).  Multiply by the compile-time 1/HW (no divide).
    # (If a bundle profile ever shows the reduce binding on the 2 XLUs, this
    # can be moved onto the idle MXU as a dot with a ones vector.)
    red_axis = 1 if channels_last else 2
    pooled = jnp.sum(x, axis=red_axis, dtype=jnp.float32) * inv_hw   # (bb, C)

    # Excite: tiny MLP in f32; weights/biases are VMEM-resident across the grid.
    h = jnp.dot(pooled, w1_ref[...], preferred_element_type=jnp.float32)
    h = h + b1_ref[...]
    h = h * jax.nn.sigmoid(h)                              # SiLU
    s = jnp.dot(h, w2_ref[...], preferred_element_type=jnp.float32)
    s = jax.nn.sigmoid(s + b2_ref[...])                    # (bb, C), f32

    # Scale: per-element upcast fused into the multiply (f32 math, v5e-safe),
    # downcast fused into the (packed, lane-dense) store.
    scale = s[:, None, :] if channels_last else s[:, :, None]
    o_ref[...] = (x.astype(jnp.float32) * scale).astype(o_ref.dtype)


def _se_pallas(x3, w1t, b1r, w2t, b2r, *, inv_hw, channels_last):
    """x3: (B, HW, C) if channels_last else (B, C, HW).  Weights f32."""
    b, sub, lane = x3.shape
    c, cr = w1t.shape
    itemsize = jnp.dtype(x3.dtype).itemsize
    hw = sub if channels_last else lane
    weight_bytes = 4 * (c * cr + cr + cr * c + c)

    bb, vmem_est = _pick_block_batch(b, sub, lane, itemsize, weight_bytes)
    grid = (b // bb,)
    vmem_limit = int(min(max(vmem_est + (8 << 20), 16 << 20), 60 << 20))

    cost = pl.CostEstimate(
        # pooling sum + broadcast multiply dominate; excite matmuls are tiny
        flops=2 * b * c * hw + 4 * b * c * cr,
        transcendentals=b * (cr + c),
        bytes_accessed=2 * b * c * hw * itemsize + weight_bytes,
    )

    kernel = functools.partial(_se_kernel, inv_hw=inv_hw,
                               channels_last=channels_last)

    return pl.pallas_call(
        kernel,
        out_shape=jax.ShapeDtypeStruct(x3.shape, x3.dtype),
        grid=grid,
        in_specs=[
            # Per-step activation block (bb batches, full trailing dims).
            pl.BlockSpec((bb, sub, lane), lambda i: (i, 0, 0)),
            # Weights/biases: constant block index -> fetched once, VMEM-resident.
            pl.BlockSpec((c, cr), lambda i: (0, 0)),
            pl.BlockSpec((1, cr), lambda i: (0, 0)),
            pl.BlockSpec((cr, c), lambda i: (0, 0)),
            pl.BlockSpec((1, c), lambda i: (0, 0)),
        ],
        out_specs=pl.BlockSpec((bb, sub, lane), lambda i: (i, 0, 0)),
        compiler_params=pltpu.CompilerParams(
            # Batch-block axis is fully independent -> shardable across v7x's
            # two TensorCores; harmless no-op on single-TC v5e/v6e.
            dimension_semantics=("parallel",),
            vmem_limit_bytes=vmem_limit,
        ),
        cost_estimate=cost,
    )(x3, w1t, b1r, w2t, b2r)


def _prep_weights(w1, b1, w2, b2):
    cr, c = w1.shape
    w1t = jnp.asarray(w1, jnp.float32).T               # (C, Cr)
    w2t = jnp.asarray(w2, jnp.float32).T               # (Cr, C)
    b1r = jnp.asarray(b1, jnp.float32).reshape(1, cr)
    b2r = jnp.asarray(b2, jnp.float32).reshape(1, c)
    return w1t, b1r, w2t, b2r


def se_module(x, w1, b1, w2, b2):
    """SEmodule forward.  x: (B, C, H, W) NCHW (any float dtype; bf16
    recommended for bandwidth).  w1: (Cr, C), b1: (Cr,), w2: (C, Cr),
    b2: (C,) -- PyTorch nn.Linear (out_features, in_features) convention."""
    b, c, h, w = x.shape
    hw = h * w
    w1t, b1r, w2t, b2r = _prep_weights(w1, b1, w2, b2)

    # Layout choice: put the 128-lane-friendly axis last (smaller padded
    # footprint == lane-dense stores + contiguous DMA rows).  128-multiple HW
    # (e.g. 16x16) keeps the zero-copy (B, C, HW) view; SE-typical 7x7/14x14
    # stages with large C go channels-last (B, HW, C) at the cost of one
    # wrapper transpose.  Models that are already NHWC on TPU should call
    # se_module_nhwc and skip that transpose entirely.
    itemsize = jnp.dtype(x.dtype).itemsize
    st = _sublane_tile(itemsize)
    foot_nchw = _pad_up(c, st) * _pad_up(hw, 128)
    foot_nhwc = _pad_up(hw, st) * _pad_up(c, 128)
    channels_last = foot_nhwc < foot_nchw

    if channels_last:
        x3 = jnp.transpose(x.reshape(b, c, hw), (0, 2, 1))     # (B, HW, C)
    else:
        x3 = x.reshape(b, c, hw)                               # (B, C, HW)

    out = _se_pallas(x3, w1t, b1r, w2t, b2r, inv_hw=float(1.0 / hw),
                     channels_last=channels_last)

    if channels_last:
        out = jnp.transpose(out, (0, 2, 1))
    return out.reshape(b, c, h, w)


def se_module_nhwc(x, w1, b1, w2, b2):
    """Same SE forward for channels-last activations: x is (B, H, W, C).
    No transpose needed -- C lands directly on the lane axis."""
    b, h, w, c = x.shape
    hw = h * w
    w1t, b1r, w2t, b2r = _prep_weights(w1, b1, w2, b2)
    out = _se_pallas(x.reshape(b, hw, c), w1t, b1r, w2t, b2r,
                     inv_hw=float(1.0 / hw), channels_last=True)
    return out.reshape(b, h, w, c)


def se_module_ref(x, w1, b1, w2, b2):
    """Pure-JAX reference identical to the PyTorch forward (in f32)."""
    xf = x.astype(jnp.float32)
    pooled = xf.mean(axis=(2, 3))                     # (B, C)
    h = pooled @ w1.T + b1
    h = h * jax.nn.sigmoid(h)                         # SiLU
    s = jax.nn.sigmoid(h @ w2.T + b2)                 # (B, C)
    return xf * s[:, :, None, None]


if __name__ == "__main__":
    reduction = 4
    keys = jax.random.split(jax.random.PRNGKey(0), 10)

    # 1) Small demo shape (HW = 256 is a 128-multiple -> zero-copy NCHW view,
    #    spatial on lanes).
    B, C, H, W = 2, 4, 16, 16
    Cr = C // reduction
    x = jax.random.normal(keys[0], (B, C, H, W), dtype=jnp.float32)
    w1 = 0.3 * jax.random.normal(keys[1], (Cr, C), dtype=jnp.float32)
    b1 = 0.1 * jax.random.normal(keys[2], (Cr,), dtype=jnp.float32)
    w2 = 0.3 * jax.random.normal(keys[3], (C, Cr), dtype=jnp.float32)
    b2 = 0.1 * jax.random.normal(keys[4], (C,), dtype=jnp.float32)

    y_ref = se_module_ref(x, w1, b1, w2, b2)
    y = jax.block_until_ready(se_module(x, w1, b1, w2, b2))
    assert y.shape == (B, C, H, W)
    assert jnp.allclose(y, y_ref, atol=1e-5, rtol=1e-5), "f32 NCHW mismatch"

    y_bf = jax.block_until_ready(se_module(x.astype(jnp.bfloat16), w1, b1, w2, b2))
    assert y_bf.dtype == jnp.bfloat16
    assert jnp.allclose(y_bf.astype(jnp.float32), y_ref, atol=5e-2, rtol=5e-2), \
        "bf16 NCHW mismatch"

    # 2) SE-typical stage (C=128, 7x7 spatial, batch 4): HW=49 is not a
    #    128-multiple -> channels-last path with C on lanes, batch-blocked
    #    grid (bb=2 -> 2 grid steps, shardable across v7x's two TCs).
    B2, C2, H2 = 4, 128, 7
    Cr2 = C2 // reduction
    x2 = jax.random.normal(keys[5], (B2, C2, H2, H2), dtype=jnp.float32)
    w1b = 0.3 * jax.random.normal(keys[6], (Cr2, C2), dtype=jnp.float32)
    b1b = 0.1 * jax.random.normal(keys[7], (Cr2,), dtype=jnp.float32)
    w2b = 0.3 * jax.random.normal(keys[8], (C2, Cr2), dtype=jnp.float32)
    b2b = 0.1 * jax.random.normal(keys[9], (C2,), dtype=jnp.float32)

    y2_ref = se_module_ref(x2, w1b, b1b, w2b, b2b)
    y2 = jax.block_until_ready(se_module(x2, w1b, b1b, w2b, b2b))
    assert jnp.allclose(y2, y2_ref, atol=1e-4, rtol=1e-4), \
        "f32 channels-last mismatch"

    # 3) NHWC entry point (no wrapper transpose), bf16 I/O, f32 internal math.
    x2_nhwc = jnp.transpose(x2, (0, 2, 3, 1)).astype(jnp.bfloat16)
    y3 = jax.block_until_ready(se_module_nhwc(x2_nhwc, w1b, b1b, w2b, b2b))
    y3_ref = jnp.transpose(y2_ref, (0, 2, 3, 1))
    assert y3.dtype == jnp.bfloat16
    assert jnp.allclose(y3.astype(jnp.float32), y3_ref, atol=5e-2, rtol=5e-2), \
        "bf16 NHWC mismatch"

    print("KERNEL_OK")
</pallas_src>

<mosaic_0001>
module attributes {stable_mosaic.version = 11 : i64} {
  func.func @_se_kernel(%arg0: i32, %arg1: memref<1x4x256xf32, #tpu.memory_space<vmem>>, %arg2: memref<4x1xf32, #tpu.memory_space<vmem>>, %arg3: memref<1x1xf32, #tpu.memory_space<vmem>>, %arg4: memref<1x4xf32, #tpu.memory_space<vmem>>, %arg5: memref<1x4xf32, #tpu.memory_space<vmem>>, %arg6: memref<1x4x256xf32, #tpu.memory_space<vmem>>) attributes {dimension_semantics = [#tpu.dimension_semantics<parallel>], iteration_bounds = array<i64: 2>, scalar_prefetch = 0 : i64, scratch_operands = 0 : i64, tpu.core_type = #tpu.core_type<tc>, window_params = [{transform_indices = @transform_0, window_bounds = array<i64: 1, 4, 256>}, {pipeline_mode = #tpu.pipeline_mode<synchronous>, transform_indices = @transform_1, window_bounds = array<i64: 4, 1>}, {pipeline_mode = #tpu.pipeline_mode<synchronous>, transform_indices = @transform_2, window_bounds = array<i64: 1, 1>}, {pipeline_mode = #tpu.pipeline_mode<synchronous>, transform_indices = @transform_3, window_bounds = array<i64: 1, 4>}, {pipeline_mode = #tpu.pipeline_mode<synchronous>, transform_indices = @transform_4, window_bounds = array<i64: 1, 4>}, {transform_indices = @transform_5, window_bounds = array<i64: 1, 4, 256>}]} {
    %c0 = arith.constant 0 : index
    %c0_0 = arith.constant 0 : index
    %c0_1 = arith.constant 0 : index
    %0 = vector.load %arg1[%c0, %c0_0, %c0_1] : memref<1x4x256xf32, #tpu.memory_space<vmem>>, vector<1x4x256xf32>
    %cst = arith.constant dense<0.000000e+00> : vector<1x4xf32>
    %1 = vector.multi_reduction <add>, %0, %cst [2] : vector<1x4x256xf32> to vector<1x4xf32>
    %cst_2 = arith.constant 3.906250e-03 : f32
    %2 = vector.broadcast %cst_2 : f32 to vector<1x4xf32>
    %3 = arith.mulf %1, %2 : vector<1x4xf32>
    %c0_3 = arith.constant 0 : index
    %c0_4 = arith.constant 0 : index
    %4 = vector.load %arg2[%c0_3, %c0_4] : memref<4x1xf32, #tpu.memory_space<vmem>>, vector<4x1xf32>
    %cst_5 = arith.constant dense<0.000000e+00> : vector<1x1xf32>
    %5 = tpu.matmul %3, %4, %cst_5 {dimension_numbers = #tpu.dot_dimension_numbers<[1], [0], [0], [1], [0, 0, 1, 1], [], []>} : vector<1x4xf32>, vector<4x1xf32>, vector<1x1xf32> -> vector<1x1xf32>
    %c0_6 = arith.constant 0 : index
    %c0_7 = arith.constant 0 : index
    %6 = vector.load %arg3[%c0_6, %c0_7] : memref<1x1xf32, #tpu.memory_space<vmem>>, vector<1x1xf32>
    %7 = arith.addf %5, %6 : vector<1x1xf32>
    %8 = arith.negf %7 : vector<1x1xf32>
    %9 = math.exp %8 : vector<1x1xf32>
    %cst_8 = arith.constant 1.000000e+00 : f32
    %10 = vector.broadcast %cst_8 : f32 to vector<1x1xf32>
    %11 = arith.addf %10, %9 : vector<1x1xf32>
    %12 = arith.divf %10, %11 : vector<1x1xf32>
    %13 = arith.mulf %7, %12 : vector<1x1xf32>
    %c0_9 = arith.constant 0 : index
    %c0_10 = arith.constant 0 : index
    %14 = vector.load %arg4[%c0_9, %c0_10] : memref<1x4xf32, #tpu.memory_space<vmem>>, vector<1x4xf32>
    %cst_11 = arith.constant dense<0.000000e+00> : vector<1x4xf32>
    %15 = tpu.matmul %13, %14, %cst_11 {dimension_numbers = #tpu.dot_dimension_numbers<[1], [0], [0], [1], [0, 0, 1, 1], [], []>} : vector<1x1xf32>, vector<1x4xf32>, vector<1x4xf32> -> vector<1x4xf32>
    %c0_12 = arith.constant 0 : index
    %c0_13 = arith.constant 0 : index
    %16 = vector.load %arg5[%c0_12, %c0_13] : memref<1x4xf32, #tpu.memory_space<vmem>>, vector<1x4xf32>
    %17 = arith.addf %15, %16 : vector<1x4xf32>
    %18 = arith.negf %17 : vector<1x4xf32>
    %19 = math.exp %18 : vector<1x4xf32>
    %cst_14 = arith.constant 1.000000e+00 : f32
    %20 = vector.broadcast %cst_14 : f32 to vector<1x4xf32>
    %21 = arith.addf %20, %19 : vector<1x4xf32>
    %22 = arith.divf %20, %21 : vector<1x4xf32>
    %23 = vector.shape_cast %22 : vector<1x4xf32> to vector<1x4x1xf32>
    %24 = vector.broadcast %23 : vector<1x4x1xf32> to vector<1x4x256xf32>
    %25 = arith.mulf %0, %24 : vector<1x4x256xf32>
    %c0_15 = arith.constant 0 : index
    %c0_16 = arith.constant 0 : index
    %c0_17 = arith.constant 0 : index
    %26 = vector.load %arg6[%c0_15, %c0_16, %c0_17] : memref<1x4x256xf32, #tpu.memory_space<vmem>>, vector<1x4x256xf32>
    tpu.vector_store %arg6[%c0_15, %c0_16, %c0_17], %25 {strides = array<i32>} : memref<1x4x256xf32, #tpu.memory_space<vmem>>, vector<1x4x256xf32>,
    return
  }
  func.func @transform_0(%arg0: i32) -> (i32, i32, i32) {
    %c0_i32 = arith.constant 0 : i32
    %c0_i32_0 = arith.constant 0 : i32
    %c0_i32_1 = arith.constant 0 : i32
    return %arg0, %c0_i32, %c0_i32_0 : i32, i32, i32
  }
  func.func @transform_1(%arg0: i32) -> (i32, i32) {
    %c0_i32 = arith.constant 0 : i32
    %c0_i32_0 = arith.constant 0 : i32
    %c0_i32_1 = arith.constant 0 : i32
    return %c0_i32, %c0_i32_0 : i32, i32
  }
  func.func @transform_2(%arg0: i32) -> (i32, i32) {
    %c0_i32 = arith.constant 0 : i32
    %c0_i32_0 = arith.constant 0 : i32
    %c0_i32_1 = arith.constant 0 : i32
    return %c0_i32, %c0_i32_0 : i32, i32
  }
  func.func @transform_3(%arg0: i32) -> (i32, i32) {
    %c0_i32 = arith.constant 0 : i32
    %c0_i32_0 = arith.constant 0 : i32
    %c0_i32_1 = arith.constant 0 : i32
    return %c0_i32, %c0_i32_0 : i32, i32
  }
  func.func @transform_4(%arg0: i32) -> (i32, i32) {
    %c0_i32 = arith.constant 0 : i32
    %c0_i32_0 = arith.constant 0 : i32
    %c0_i32_1 = arith.constant 0 : i32
    return %c0_i32, %c0_i32_0 : i32, i32
  }
  func.func @transform_5(%arg0: i32) -> (i32, i32, i32) {
    %c0_i32 = arith.constant 0 : i32
    %c0_i32_0 = arith.constant 0 : i32
    %c0_i32_1 = arith.constant 0 : i32
    return %arg0, %c0_i32, %c0_i32_0 : i32, i32, i32
  }
}

</mosaic_0001>

<bundles_post_ra>
// kernel: tpu_custom_call.1
= control target key start
LH: loop header
LB: loop body
LE: loop exit
PB: predicated region body
PF: predicated region fallthrough
CT: control target
= control target key end

     0   :  { %s939_s0 = inlined_call_operand.hbm [shape: f32[2,4,256], index: 0, kind: input, shape index: {}]   ;;  %s940_s1 = inlined_call_operand.vmem [shape: f32[4,1], index: 1, kind: input, shape index: {}]   ;;  %s941_s2 = inlined_call_operand.<no memory space> [shape: f32[1,1], index: 2, kind: input, shape index: {}]   ;;  %s942_s3 = inlined_call_operand.vmem [shape: f32[1,4], index: 3, kind: input, shape index: {}]   ;;  %s943_s4 = inlined_call_operand.vmem [shape: f32[1,4], index: 4, kind: input, shape index: {}]   ;;  %s944_s5 = inlined_call_operand.hbm [shape: f32[2,4,256], index: 5, kind: output, shape index: {}]  }
   0x1   :  { %v10_v0 = vstv %s941_s2 }
   0x2   :  { %11 = vst [vmem:[#allocation2] sm:$0x1] %v10_v0 }
   0x3   :  { %12 = vsyncpa [#allocation4], 0 }
   0x4   :  { %14 = vsyncpa [#allocation4 + $0x1], 0 }
   0x5   :  { %15 = vsyncpa [#allocation5], 0 }
   0x6   :  { %17 = vsyncpa [#allocation5 + $0x1], 0  ;;  %s765_s20 = smov 0   ;;  %s767_s21 = smov 0  }
   0x7   :  { %s769_s22 = smov 0   ;;  %s771_s23 = smov 0  }
   0x8 LB: > { %s786_s2 = sadd.s32 4294967295, %s725_s23   ;;  %s535_s24 = sadd.s32 4294967294, %s725_s23   ;;  %s725_s23 = sphi %s771_s23, %s959_s23   ;;  %s721_s22 = sphi %s769_s22, %s958_s22   ;;  %s717_s21 = sphi %s767_s21, %s957_s21   ;;  %s713_s20 = sphi %s765_s20, %s956_s20  }
   0x9   : > { %s790_s25 = sadd.s32 1, %s725_s23   ;;  %s30_s26 = sadd.s32 1, %s721_s22 }
   0xa   : > { %s27_s27 = ssub.s32 %s725_s23, %s790_s25  ;;  %p37_p0 = scmp.ne.s32.totalorder %s721_s22, %s717_s21 }
   0xb   : > { %p28_p1 = scmp.eq.s32.totalorder %s27_s27, 0  ;;  %p38_p2 = scmp.eq.s32.totalorder %s725_s23, 0 }
   0xc   : > { %p43_p3 = scmp.ne.s32.totalorder %s717_s21, %s713_s20  ;;  %p44_p4 = scmp.eq.s32.totalorder %s786_s2, 0 }
   0xd   : > { %s802_s28 = scalar_select %p28_p1, %s721_s22, %s30_s26  }
   0xe   : > { %p804_p5 = por %p38_p2, %p37_p0  ;;  %p808_p6 = por %p44_p4, %p43_p3 }
   0xf   : > { %p151_p7 = scmp.eq.s32.totalorder %s786_s2, 1  ;;  %p157_p8 = scmp.eq.s32.totalorder %s535_s24, 1 }
  0x10   : > { %p583_p10 = scmp.lt.s32.totalorder %s725_s23, 2  ;;  %s189_s8 = sand.u32 1, %s721_s22  }
  0x11   : > { %p815_p11 = por %p151_p7, %p37_p0  ;;  %p819_p12 = por %p157_p8, %p43_p3 }
  0x12   : > { %s555_s9 = sshll.u32 %s725_s23, 7  ;;  %s538_s10 = sshll.u32 %s189_s8, 3 }
  0x13   : > { %s948_s6 = scalar_select %p815_p11, 1, 0 }
  0x14   : > { %s949_s7 = scalar_select %p819_p12, 1, 0 }
  0x15   : > { %s828_s13 = scalar_lea.hbm %s939_s0, %s555_s9  ;;  %s193_s14 = scalar_lea.vmem [#allocation3], %s538_s10 }
  0x16   : > { %s201_s15 = sshll.u32 %s193_s14, 4  ;;  %p832_p13 = pnand %p583_p10, %p804_p5  ;;  %s836_s15 = int_to_ptr.vmem [resolvable:$true] %s201_s15 }
  0x17   : > { %s190_s17 = scalar_lea.sflag [#allocation4], %s189_s8  ;;  %s629_s18 = scalar_lea.hbm %s828_s13, 128 }
  0x18   : > { %p630_p2 = scmp.ne.s32.totalorder %s828_s13, %s629_s18  ;;  %p631_p3 = pneg %p832_p13 }
  0x19   : > { %s634_s26 = scalar_lea.hbm %s939_s0, 256  ;;  %p635_p5 = scmp.lt.u32.totalorder %s828_s13, %s939_s0 }
  0x1a   : > { %p632_p4 = pnand %p631_p3, %p630_p2  ;;  %p636_p8 = scmp.lt.u32.totalorder %s634_s26, %s629_s18 }
  0x1b   : > { %p638_p9 = scmp.lt.u32.totalorder %s629_s18, %s828_s13 }
  0x1c   : > { %p633_p7 = pneg %p632_p4  ;;  %p637_p10 = por %p636_p8, %p635_p5 }
  0x1e   : > { %p639_p0 = por %p638_p9, %p637_p10 }
  0x20   : > { %p640_p1 = pnand %p639_p0, %p633_p7 }
  0x22   : > { %643 = shalt.err (!%p640_p1)
}
  0x23   : > { %s644_s8 = scalar_lea.vmem %s836_s15, 128  ;;  %s727_s9 = smov [#allocation3]  }
  0x24   : > { %p645_p2 = scmp.ne.s32.totalorder %s836_s15, %s644_s8  ;;  %s649_s10 = sshll.u32 %s727_s9, 4  ;;  %s650_s10 = int_to_ptr.vmem [resolvable:$false] %s649_s10 }
  0x25   : > { %s651_s11 = scalar_lea.vmem %s650_s10, 256  ;;  %p652_p11 = scmp.lt.s32.totalorder %s836_s15, %s650_s10 }
  0x26   : > { %p647_p4 = pnand %p645_p2, %p631_p3  ;;  %p653_p5 = scmp.lt.s32.totalorder %s651_s11, %s644_s8 }
  0x28   : > { %p648_p12 = pneg %p647_p4  ;;  %p654_p8 = por %p653_p5, %p652_p11 }
  0x2a   : > { %p655_p9 = pnand %p654_p8, %p648_p12 }
  0x2c   : > { %658 = shalt.err (!%p655_p9)
}
  0x2d   : > { %578 = dma.hbm_to_vmem [thread:$0]  (!%p832_p13), %s828_s13, 128, %s836_s15, %s190_s17  }
  0x2e   : > { %p951_p0 = scmp.lt.s32.totalorder %s725_s23, 3  ;;  %p952_p1 = scmp.ge.s32.totalorder %s725_s23, 1 }
  0x30   : > { %p207_p3 = pnand %p952_p1, %p951_p0 }
  0x31   : > { %s870_s12 = sand.u32 (!%p207_p3), 1, %s717_s21  }
  0x32   : > { %210 = sbr.rel (%p207_p3) target bundleno = 827 (0x33b), region = 40  ;;  %s542_s14 = sshll.u32 (!%p207_p3), %s870_s12, 3 }
  0x33   : > { %s213_s18 = scalar_lea.sflag (!%p207_p3), [#allocation4], %s870_s12  ;;  %s216_s16 = scalar_lea.vmem (!%p207_p3), [#allocation3], %s542_s14 }
  0x39   : > { %704 = dma.done.wait (%p808_p6), %s213_s18, 128  }
  0x3a   : > { %706 = vsyncadd (%p808_p6), %s213_s18, 4294967168  ;;  %vm247_vm0 = vcmask 1043456   ;;  %v243_v1 = vld [vmem:[%s216_s16] sm:$0xff]  ;;  %v728_v6 = vmov 0.0   ;;  %vm729_vm1 = vmmov 0   ;;  %v257_v8 = vlaneseq  ;;  %s556_s26 = sshll.u32 %s786_s2, 7 }
  0x3b   : > { %v245_v2 = vcombine.high %v243_v1, %v243_v1  ;;  %v248_v3 = vsel %vm247_vm0, %v243_v1, 0.0  ;;  %561 = vmatprep.subr.mxu0 %v728_v6  ;;  %v254_v7 = vld [vmem:[%s940_s1] sm:$0xf]  ;;  %566 = vmatprep.subr.mxu1 %v728_v6  ;;  %vm263_vm2 = vcmask 31744   ;;  %vm352_vm3 = vcmask 1040384   ;;  %s242_s27 = scalar_lea.vmem [#allocation6], %s542_s14  ;;  %s895_s10 = scalar_lea.hbm %s944_s5, %s556_s26 }
  0x3c   : > { %562 = vmatpush3.msk.msra.mxu0 %vm247_vm0, %v254_v7  ;;  %563 = vmatprep.mubr.msk.f32.mxu0 %vm729_vm1, %v728_v6  ;;  %v258_v9 = vand.u32 127, %v257_v8  ;;  %v260_v10 = vshrl.u32 %v257_v8, 7  ;;  %v346_v15 = vld [vmem:[%s942_s3] sm:$0x1]  ;;  %vm348_vm4 = vcmask 7168   ;;  %s465_s29 = sshll.u32 %s242_s27, 4  ;;  %s897_s29 = int_to_ptr.vmem [resolvable:$true] %s465_s29 }
  0x3d   : > { %v249_v4 = vsel %vm247_vm0, %v245_v2, 0.0  ;;  %568 = vmatprep.mubr.msk.f32.mxu1 %vm729_vm1, %v728_v6  ;;  %567 = vmatpush3.msk.msra.mxu1 %vm352_vm3, %v346_v15  ;;  %v255_v16 = vld [vmem:[#allocation2] sm:$0x1]  ;;  %v730_v35 = vmov 839922192   ;;  %s451_s11 = scalar_lea.sflag [#allocation5], %s870_s12 }
  0x3e   : > { %v250_v5 = vadd.f32 %v249_v4, %v248_v3  ;;  %v261_v11 = vsub.s32 %v258_v9, %v260_v10  ;;  %v347_v25 = vld [vmem:[%s943_s4] sm:$0x1]  ;;  %v434_v32 = vsub.s32 0, %v260_v10  ;;  %v441_v36 = vunpack.c.l.s4 %v730_v35  ;;  %s659_s18 = scalar_lea.vmem %s897_s29, 128  ;;  %p953_p11 = scmp.ne.s32.totalorder %s948_s6, 0 }
  0x3f   : > { %p660_p6 = scmp.ne.s32.totalorder %s897_s29, %s659_s18  ;;  %s731_s2 = smov [#allocation6]  }
  0x40   : > { %251 = vadd.xlane.f32.xlu0 %v250_v5  ;;  %v442_v37 = vunpack.c.0.s8 %v441_v36  ;;  %s663_s14 = sshll.u32 %s731_s2, 4  ;;  %s664_s14 = int_to_ptr.vmem [resolvable:$false] %s663_s14 }
  0x41   : > { %p661_p12 = pnand %p660_p6, %p953_p11  ;;  %s665_s16 = scalar_lea.vmem %s664_s14, 256 }
  0x42   : > { %v445_v38 = vsub.s32 %v442_v37, %v260_v10  ;;  %p666_p7 = scmp.lt.s32.totalorder %s897_s29, %s664_s14  ;;  %p667_p10 = scmp.lt.s32.totalorder %s665_s16, %s659_s18 }
  0x43   : > { %p662_p13 = pneg %p661_p12 }
  0x44   : > { %p668_p2 = por %p667_p10, %p666_p7 }
  0x46   : > { %p669_p4 = pnand %p668_p2, %p662_p13 }
  0xcd   : > { %v252_v12 = vpop.xlane.xlu0 %251 }
  0xce   : > { %v253_v13 = vmul.f32 0.00390625, %v252_v12 }
  0xd0   : > { %v262_v14 = vrot.slane %v253_v13, %v261_v11 }
  0xd2   : > { %564 = vmatmul.mubr.msk.f32.vlgmr.msra.gmra.mrb[0].mxu0 %vm263_vm2, %v262_v14 }
 0x1a5   : > { %v335_v17 = vpop.f32.mrb[0].mxu0 }
 0x1a6   : > { %v336_v18 = vadd.f32 %v335_v17, %v255_v16  ;;  %v565_v19 = vpop.f32.mrb[1].mxu0 }
 0x1a8   : > { %v546_v20 = vmul.f32 -1.442695, %v336_v18 }
 0x1aa   : > { %621 = vpow2.f32 %v546_v20 }
 0x1b4   : > { %v622_v21 = vpop.eup %621 }
 0x1b5   : > { %v342_v22 = vadd.f32 1.0, %v622_v21 }
 0x1b7   : > { %623 = vrcp.f32 %v342_v22 }
 0x1c1   : > { %v624_v23 = vpop.eup %623 }
 0x1c2   : > { %v345_v24 = vmul.f32 %v624_v23, %v336_v18 }
 0x1c4   : > { %569 = vmatmul.mubr.msk.f32.vlgmr.msra.gmra.mrb[0].mxu1 %vm348_vm4, %v345_v24 }
 0x297   : > { %v422_v26 = vpop.f32.mrb[0].mxu1 }
 0x298   : > { %v423_v27 = vadd.f32 %v422_v26, %v347_v25  ;;  %v570_v28 = vpop.f32.mrb[1].mxu1 }
 0x29a   : > { %v549_v29 = vmul.f32 -1.442695, %v423_v27 }
 0x29c   : > { %625 = vpow2.f32 %v549_v29 }
 0x2a6   : > { %v626_v30 = vpop.eup %625 }
 0x2a7   : > { %v429_v31 = vadd.f32 1.0, %v626_v30 }
 0x2a9   : > { %627 = vrcp.f32 %v429_v31 }
 0x2b3   : > { %v628_v33 = vpop.eup %627 }
 0x2b4   : > { %v435_v34 = vrot.slane %v628_v33, %v434_v32 }
 0x2b6   : > { %437 = vbcast.lane.b32.xlu0 %v435_v34, 256 }
 0x328   : > { %v438_v39 = vpop.permute.xlu0 %437 }
 0x329   : > { %v446_v40 = vrot.slane %v438_v39, %v445_v38 }
 0x32b   : > { %v448_v41 = vmul.f32 %v446_v40, %v243_v1 }
 0x32d   : > { %449 = vst [vmem:[%s242_s27] sm:$0xff] %v448_v41 }
 0x32e   : > { %672 = shalt.err (!%p669_p4)
}
 0x32f   : > { %s673_s12 = scalar_lea.hbm %s895_s10, 128  ;;  %s677_s30 = scalar_lea.hbm %s944_s5, 256 }
 0x330   : > { %p674_p5 = scmp.ne.s32.totalorder %s895_s10, %s673_s12  ;;  %p678_p0 = scmp.lt.u32.totalorder %s895_s10, %s944_s5 }
 0x331   : > { %p679_p1 = scmp.lt.u32.totalorder %s677_s30, %s673_s12  ;;  %p681_p6 = scmp.lt.u32.totalorder %s673_s12, %s895_s10 }
 0x332   : > { %p675_p8 = pnand %p674_p5, %p953_p11 }
 0x333   : > { %p680_p3 = por %p679_p1, %p678_p0 }
 0x334   : > { %p676_p9 = pneg %p675_p8 }
 0x335   : > { %p682_p12 = por %p681_p6, %p680_p3 }
 0x337   : > { %p683_p13 = pnand %p682_p12, %p676_p9 }
 0x339   : > { %686 = shalt.err (!%p683_p13)
}
 0x33a   : > { %573 = dma.vmem_to_hbm [thread:$0]  (%p953_p11), %s897_s29, 128, %s895_s10, %s451_s11  }
 0x33b PF: > { %s477_s24 = sand.u32 1, %s713_s20   ;;  %p954_p7 = scmp.ne.s32.totalorder %s949_s7, 0 }
 0x33c   : > { %p955_p10 = scmp.ge.s32.totalorder %s725_s23, 2  ;;  %s478_s26 = scalar_lea.sflag [#allocation5], %s477_s24 }
 0x33e   : > { %p580_p2 = pnand %p955_p10, %p954_p7 }
 0x340   : > { %708 = dma.done.wait (!%p580_p2), %s478_s26, 128  }
 0x341   : > { %710 = vsyncadd (!%p580_p2), %s478_s26, 4294967168  ;;  %p20_p4 = scmp.ge.s32.totalorder %s790_s25, 4   ;;  %s956_s20 = smov %s717_s21 }
 0x342   : > { %s957_s21 = smov %s721_s22  ;;  %s958_s22 = smov %s802_s28 }
 0x343   : > { %s959_s23 = smov %s790_s25  ;;  %22 = sbr.rel (!%p20_p4) target bundleno = 8 (0x8), region = 85 }
 0x34a   :  { %483 = vsyncpa [#allocation4], 1 }
 0x34b   :  { %485 = vsyncpa [#allocation4 + $0x1], 1 }
 0x34c   :  { %486 = vsyncpa [#allocation5], 1 }
 0x34d   :  { %488 = vsyncpa [#allocation5 + $0x1], 1 }

</bundles_post_ra>
